<compile_context>
chip_gen: v7x
topology: tpu7x:2x2x1
jax: 0.10.0
libtpu: 0.0.40
codegen_flags: <defaults>
</compile_context>

<pallas_src>
import jax
import jax.numpy as jnp
from jax.experimental import pallas as pl
from jax.experimental.pallas import tpu as pltpu


def _round_up(x, m):
    return ((x + m - 1) // m) * m


def bezier_kernel(x0_ref, x3_ref, t_ref,
                  w1a_ref, w1b_ref, b1_ref,
                  w2_ref, b2_ref,
                  w3_ref, b3_ref,
                  w4_ref, b4_ref,
                  bez_ref, dbez_ref):
    # Feature-major tiles: features on sublanes, batch on lanes.
    x0 = x0_ref[...]                      # [S, bb]
    x3 = x3_ref[...]                      # [S, bb]
    t = t_ref[...]                        # [1, bb] -> broadcasts over sublanes

    # control_points MLP: Linear -> ReLU -> Linear -> ReLU -> Linear -> ReLU -> Linear
    # concat(x0, x3) @ W1^T is expressed as W1a^T @ x0 + W1b^T @ x3 (no concat).
    h = (jnp.dot(w1a_ref[...], x0, preferred_element_type=jnp.float32)
         + jnp.dot(w1b_ref[...], x3, preferred_element_type=jnp.float32)
         + b1_ref[...])                   # [H, bb]
    h = jnp.maximum(h, 0.0)
    h = jnp.maximum(
        jnp.dot(w2_ref[...], h, preferred_element_type=jnp.float32) + b2_ref[...], 0.0)
    h = jnp.maximum(
        jnp.dot(w3_ref[...], h, preferred_element_type=jnp.float32) + b3_ref[...], 0.0)

    # Single merged final layer; x1 / x2 are sublane slices (S multiple of 8).
    out = jnp.dot(w4_ref[...], h, preferred_element_type=jnp.float32) + b4_ref[...]  # [2S, bb]
    S = x0.shape[0]
    x1 = out[:S, :]
    x2 = out[S:, :]

    # Cubic Bezier coefficients, computed once as lane-dense [1, bb] rows.
    omt = 1.0 - t
    omt2 = omt * omt
    t2 = t * t
    c0 = omt2 * omt                       # (1-t)^3
    c1 = 3.0 * omt2 * t                   # 3 (1-t)^2 t
    c2 = 3.0 * omt * t2                   # 3 (1-t) t^2
    c3 = t2 * t                           # t^3
    two_omt_t = 2.0 * omt * t

    bez = c0 * x0 + c1 * x1 + c2 * x2 + c3 * x3
    dbez = 3.0 * (omt2 * (x1 - x0) + two_omt_t * (x2 - x1) + t2 * (x3 - x2))

    bez_ref[...] = bez.astype(bez_ref.dtype)
    dbez_ref[...] = dbez.astype(dbez_ref.dtype)


def bezier_interpolant3(x0, x3, t, params, *, block_b=1024):
    """x0, x3: [B, S], t: [B, 1]. Returns (bezier, dt_bezier), each [B, S]."""
    B, S = x0.shape
    (w1t, b1, w2t, b2, w3t, b3, w4t, b4) = params
    H = w1t.shape[0]

    # Split the first (transposed) weight by input half so the kernel avoids a
    # concat:  W1^T @ concat(x0, x3) = W1a^T @ x0 + W1b^T @ x3.
    w1a_t = w1t[:, :S]                    # [H, S]
    w1b_t = w1t[:, S:]                    # [H, S]

    # Batch tile: multiple of 128 lanes, capped at the (rounded-up) batch.
    bb = _round_up(min(block_b, _round_up(B, 128)), 128)
    Bp = _round_up(B, bb)
    num_blocks = Bp // bb

    # Feature-major layout: batch on the lane axis; pad batch (columns) so the
    # grid blocks are static.  Padded columns are garbage but sliced off.
    pad = Bp - B
    x0t = jnp.pad(x0.T, ((0, 0), (0, pad)))     # [S, Bp]
    x3t = jnp.pad(x3.T, ((0, 0), (0, pad)))     # [S, Bp]
    tt = jnp.pad(t.T, ((0, 0), (0, pad)))       # [1, Bp]

    # Batch-tiled specs for activations / outputs; resident specs for params.
    act_spec = lambda rows: pl.BlockSpec((rows, bb), lambda i: (0, i))
    resident = lambda arr: pl.BlockSpec(arr.shape, lambda i: (0, 0))

    in_specs = [
        act_spec(S), act_spec(S), act_spec(1),
        resident(w1a_t), resident(w1b_t), resident(b1),
        resident(w2t), resident(b2),
        resident(w3t), resident(b3),
        resident(w4t), resident(b4),
    ]
    out_specs = (act_spec(S), act_spec(S))

    param_bytes = 4 * sum(int(p.size) for p in (w1t, b1, w2t, b2, w3t, b3, w4t, b4))
    mlp_flops = 2 * (2 * S) * H + 2 * H * H + 2 * H * H + 2 * H * (2 * S)
    cost = pl.CostEstimate(
        flops=int(Bp * (mlp_flops + 20 * S)),
        transcendentals=0,
        bytes_accessed=int(4 * Bp * (4 * S + 1) + param_bytes),
    )

    bezt, dbezt = pl.pallas_call(
        bezier_kernel,
        out_shape=(jax.ShapeDtypeStruct((S, Bp), jnp.float32),
                   jax.ShapeDtypeStruct((S, Bp), jnp.float32)),
        grid_spec=pltpu.PrefetchScalarGridSpec(
            num_scalar_prefetch=0,
            grid=(num_blocks,),
            in_specs=in_specs,
            out_specs=out_specs,
        ),
        compiler_params=pltpu.CompilerParams(
            dimension_semantics=("parallel",)),
        cost_estimate=cost,
    )(x0t, x3t, tt, w1a_t, w1b_t, b1, w2t, b2, w3t, b3, w4t, b4)

    # Back to the module's batch-major layout.
    bez = bezt[:, :B].T
    dbez = dbezt[:, :B].T
    return bez, dbez


def init_params(key, state_dim, hid_dim):
    """Deterministic synthetic parameters (same shapes as the nn.Linear stack),
    stored pre-transposed: W^T is [out, in], bias is [out, 1]."""
    ks = jax.random.split(key, 8)

    def lin(kw, kb, fan_in, fan_out):
        bound = 1.0 / jnp.sqrt(fan_in)
        wt = jax.random.uniform(kw, (fan_out, fan_in), jnp.float32, -bound, bound)
        b = jax.random.uniform(kb, (fan_out, 1), jnp.float32, -bound, bound)
        return wt, b

    w1t, b1 = lin(ks[0], ks[1], 2 * state_dim, hid_dim)
    w2t, b2 = lin(ks[2], ks[3], hid_dim, hid_dim)
    w3t, b3 = lin(ks[4], ks[5], hid_dim, hid_dim)
    w4t, b4 = lin(ks[6], ks[7], hid_dim, 2 * state_dim)
    return (w1t, b1, w2t, b2, w3t, b3, w4t, b4)


def reference(x0, x3, t, params):
    """Pure-JAX reference mirroring the PyTorch forward (y = x @ W^T + b)."""
    (w1t, b1, w2t, b2, w3t, b3, w4t, b4) = params
    S = x0.shape[1]
    z = jnp.concatenate([x0, x3], axis=1)
    h = jnp.maximum(z @ w1t.T + b1.T, 0.0)
    h = jnp.maximum(h @ w2t.T + b2.T, 0.0)
    h = jnp.maximum(h @ w3t.T + b3.T, 0.0)
    x = h @ w4t.T + b4.T
    x1, x2 = x[:, :S], x[:, S:]
    omt = 1.0 - t
    bez = omt**3 * x0 + 3 * omt**2 * t * x1 + 3 * omt * t**2 * x2 + t**3 * x3
    dbez = 3 * omt**2 * (x1 - x0) + 6 * omt * t * (x2 - x1) + 3 * t**2 * (x3 - x2)
    return bez, dbez


if __name__ == "__main__":
    state_dim = 16
    hid_dim = 64      # matches the nn.Module default
    batch = 8

    key = jax.random.PRNGKey(0)
    k0, k3, kt, kp = jax.random.split(key, 4)
    x0 = jax.random.normal(k0, (batch, state_dim), jnp.float32)
    x3 = jax.random.normal(k3, (batch, state_dim), jnp.float32)
    t = jax.random.uniform(kt, (batch, 1), jnp.float32)
    params = init_params(kp, state_dim, hid_dim)

    bez, dbez = jax.jit(bezier_interpolant3)(x0, x3, t, params)
    jax.block_until_ready((bez, dbez))

    bez_ref, dbez_ref = reference(x0, x3, t, params)
    assert jnp.allclose(bez, bez_ref, atol=1e-5, rtol=1e-5)
    assert jnp.allclose(dbez, dbez_ref, atol=1e-5, rtol=1e-5)

    print("KERNEL_OK")
</pallas_src>

<mosaic_0001>
module attributes {stable_mosaic.version = 11 : i64} {
  func.func @bezier_kernel(%arg0: i32, %arg1: memref<16x128xf32, #tpu.memory_space<vmem>>, %arg2: memref<16x128xf32, #tpu.memory_space<vmem>>, %arg3: memref<1x128xf32, #tpu.memory_space<vmem>>, %arg4: memref<64x16xf32, #tpu.memory_space<vmem>>, %arg5: memref<64x16xf32, #tpu.memory_space<vmem>>, %arg6: memref<64x1xf32, #tpu.memory_space<vmem>>, %arg7: memref<64x64xf32, #tpu.memory_space<vmem>>, %arg8: memref<64x1xf32, #tpu.memory_space<vmem>>, %arg9: memref<64x64xf32, #tpu.memory_space<vmem>>, %arg10: memref<64x1xf32, #tpu.memory_space<vmem>>, %arg11: memref<32x64xf32, #tpu.memory_space<vmem>>, %arg12: memref<32x1xf32, #tpu.memory_space<vmem>>, %arg13: memref<16x128xf32, #tpu.memory_space<vmem>>, %arg14: memref<16x128xf32, #tpu.memory_space<vmem>>) attributes {dimension_semantics = [#tpu.dimension_semantics<parallel>], iteration_bounds = array<i64: 1>, scalar_prefetch = 0 : i64, scratch_operands = 0 : i64, tpu.core_type = #tpu.core_type<tc>, window_params = [{transform_indices = @transform_0, window_bounds = array<i64: 16, 128>}, {transform_indices = @transform_1, window_bounds = array<i64: 16, 128>}, {transform_indices = @transform_2, window_bounds = array<i64: 1, 128>}, {pipeline_mode = #tpu.pipeline_mode<synchronous>, transform_indices = @transform_3, window_bounds = array<i64: 64, 16>}, {pipeline_mode = #tpu.pipeline_mode<synchronous>, transform_indices = @transform_4, window_bounds = array<i64: 64, 16>}, {pipeline_mode = #tpu.pipeline_mode<synchronous>, transform_indices = @transform_5, window_bounds = array<i64: 64, 1>}, {pipeline_mode = #tpu.pipeline_mode<synchronous>, transform_indices = @transform_6, window_bounds = array<i64: 64, 64>}, {pipeline_mode = #tpu.pipeline_mode<synchronous>, transform_indices = @transform_7, window_bounds = array<i64: 64, 1>}, {pipeline_mode = #tpu.pipeline_mode<synchronous>, transform_indices = @transform_8, window_bounds = array<i64: 64, 64>}, {pipeline_mode = #tpu.pipeline_mode<synchronous>, transform_indices = @transform_9, window_bounds = array<i64: 64, 1>}, {pipeline_mode = #tpu.pipeline_mode<synchronous>, transform_indices = @transform_10, window_bounds = array<i64: 32, 64>}, {pipeline_mode = #tpu.pipeline_mode<synchronous>, transform_indices = @transform_11, window_bounds = array<i64: 32, 1>}, {transform_indices = @transform_12, window_bounds = array<i64: 16, 128>}, {transform_indices = @transform_13, window_bounds = array<i64: 16, 128>}]} {
    %c0 = arith.constant 0 : index
    %c0_0 = arith.constant 0 : index
    %0 = vector.load %arg1[%c0, %c0_0] : memref<16x128xf32, #tpu.memory_space<vmem>>, vector<16x128xf32>
    %c0_1 = arith.constant 0 : index
    %c0_2 = arith.constant 0 : index
    %1 = vector.load %arg2[%c0_1, %c0_2] : memref<16x128xf32, #tpu.memory_space<vmem>>, vector<16x128xf32>
    %c0_3 = arith.constant 0 : index
    %c0_4 = arith.constant 0 : index
    %2 = vector.load %arg3[%c0_3, %c0_4] : memref<1x128xf32, #tpu.memory_space<vmem>>, vector<1x128xf32>
    %c0_5 = arith.constant 0 : index
    %c0_6 = arith.constant 0 : index
    %3 = vector.load %arg4[%c0_5, %c0_6] : memref<64x16xf32, #tpu.memory_space<vmem>>, vector<64x16xf32>
    %cst = arith.constant dense<0.000000e+00> : vector<64x128xf32>
    %4 = tpu.matmul %3, %0, %cst {dimension_numbers = #tpu.dot_dimension_numbers<[1], [0], [0], [1], [0, 0, 1, 1], [], []>} : vector<64x16xf32>, vector<16x128xf32>, vector<64x128xf32> -> vector<64x128xf32>
    %c0_7 = arith.constant 0 : index
    %c0_8 = arith.constant 0 : index
    %5 = vector.load %arg5[%c0_7, %c0_8] : memref<64x16xf32, #tpu.memory_space<vmem>>, vector<64x16xf32>
    %cst_9 = arith.constant dense<0.000000e+00> : vector<64x128xf32>
    %6 = tpu.matmul %5, %1, %cst_9 {dimension_numbers = #tpu.dot_dimension_numbers<[1], [0], [0], [1], [0, 0, 1, 1], [], []>} : vector<64x16xf32>, vector<16x128xf32>, vector<64x128xf32> -> vector<64x128xf32>
    %7 = arith.addf %4, %6 : vector<64x128xf32>
    %c0_10 = arith.constant 0 : index
    %c0_11 = arith.constant 0 : index
    %8 = vector.load %arg6[%c0_10, %c0_11] : memref<64x1xf32, #tpu.memory_space<vmem>>, vector<64x1xf32>
    %9 = vector.broadcast %8 : vector<64x1xf32> to vector<64x128xf32>
    %10 = arith.addf %7, %9 : vector<64x128xf32>
    %cst_12 = arith.constant 0.000000e+00 : f32
    %11 = vector.broadcast %cst_12 : f32 to vector<64x128xf32>
    %12 = arith.maximumf %10, %11 : vector<64x128xf32>
    %c0_13 = arith.constant 0 : index
    %c0_14 = arith.constant 0 : index
    %13 = vector.load %arg7[%c0_13, %c0_14] : memref<64x64xf32, #tpu.memory_space<vmem>>, vector<64x64xf32>
    %cst_15 = arith.constant dense<0.000000e+00> : vector<64x128xf32>
    %14 = tpu.matmul %13, %12, %cst_15 {dimension_numbers = #tpu.dot_dimension_numbers<[1], [0], [0], [1], [0, 0, 1, 1], [], []>} : vector<64x64xf32>, vector<64x128xf32>, vector<64x128xf32> -> vector<64x128xf32>
    %c0_16 = arith.constant 0 : index
    %c0_17 = arith.constant 0 : index
    %15 = vector.load %arg8[%c0_16, %c0_17] : memref<64x1xf32, #tpu.memory_space<vmem>>, vector<64x1xf32>
    %16 = vector.broadcast %15 : vector<64x1xf32> to vector<64x128xf32>
    %17 = arith.addf %14, %16 : vector<64x128xf32>
    %cst_18 = arith.constant 0.000000e+00 : f32
    %18 = vector.broadcast %cst_18 : f32 to vector<64x128xf32>
    %19 = arith.maximumf %17, %18 : vector<64x128xf32>
    %c0_19 = arith.constant 0 : index
    %c0_20 = arith.constant 0 : index
    %20 = vector.load %arg9[%c0_19, %c0_20] : memref<64x64xf32, #tpu.memory_space<vmem>>, vector<64x64xf32>
    %cst_21 = arith.constant dense<0.000000e+00> : vector<64x128xf32>
    %21 = tpu.matmul %20, %19, %cst_21 {dimension_numbers = #tpu.dot_dimension_numbers<[1], [0], [0], [1], [0, 0, 1, 1], [], []>} : vector<64x64xf32>, vector<64x128xf32>, vector<64x128xf32> -> vector<64x128xf32>
    %c0_22 = arith.constant 0 : index
    %c0_23 = arith.constant 0 : index
    %22 = vector.load %arg10[%c0_22, %c0_23] : memref<64x1xf32, #tpu.memory_space<vmem>>, vector<64x1xf32>
    %23 = vector.broadcast %22 : vector<64x1xf32> to vector<64x128xf32>
    %24 = arith.addf %21, %23 : vector<64x128xf32>
    %cst_24 = arith.constant 0.000000e+00 : f32
    %25 = vector.broadcast %cst_24 : f32 to vector<64x128xf32>
    %26 = arith.maximumf %24, %25 : vector<64x128xf32>
    %c0_25 = arith.constant 0 : index
    %c0_26 = arith.constant 0 : index
    %27 = vector.load %arg11[%c0_25, %c0_26] : memref<32x64xf32, #tpu.memory_space<vmem>>, vector<32x64xf32>
    %cst_27 = arith.constant dense<0.000000e+00> : vector<32x128xf32>
    %28 = tpu.matmul %27, %26, %cst_27 {dimension_numbers = #tpu.dot_dimension_numbers<[1], [0], [0], [1], [0, 0, 1, 1], [], []>} : vector<32x64xf32>, vector<64x128xf32>, vector<32x128xf32> -> vector<32x128xf32>
    %c0_28 = arith.constant 0 : index
    %c0_29 = arith.constant 0 : index
    %29 = vector.load %arg12[%c0_28, %c0_29] : memref<32x1xf32, #tpu.memory_space<vmem>>, vector<32x1xf32>
    %30 = vector.broadcast %29 : vector<32x1xf32> to vector<32x128xf32>
    %31 = arith.addf %28, %30 : vector<32x128xf32>
    %32 = vector.extract_strided_slice %31 {offsets = [0, 0], sizes = [16, 128], strides = [1, 1]} : vector<32x128xf32> to vector<16x128xf32>
    %33 = vector.extract_strided_slice %31 {offsets = [16, 0], sizes = [16, 128], strides = [1, 1]} : vector<32x128xf32> to vector<16x128xf32>
    %cst_30 = arith.constant 1.000000e+00 : f32
    %34 = vector.broadcast %cst_30 : f32 to vector<1x128xf32>
    %35 = arith.subf %34, %2 : vector<1x128xf32>
    %36 = arith.mulf %35, %35 : vector<1x128xf32>
    %37 = arith.mulf %2, %2 : vector<1x128xf32>
    %38 = arith.mulf %36, %35 : vector<1x128xf32>
    %cst_31 = arith.constant 3.000000e+00 : f32
    %39 = vector.broadcast %cst_31 : f32 to vector<1x128xf32>
    %40 = arith.mulf %39, %36 : vector<1x128xf32>
    %41 = arith.mulf %40, %2 : vector<1x128xf32>
    %cst_32 = arith.constant 3.000000e+00 : f32
    %42 = vector.broadcast %cst_32 : f32 to vector<1x128xf32>
    %43 = arith.mulf %42, %35 : vector<1x128xf32>
    %44 = arith.mulf %43, %37 : vector<1x128xf32>
    %45 = arith.mulf %37, %2 : vector<1x128xf32>
    %cst_33 = arith.constant 2.000000e+00 : f32
    %46 = vector.broadcast %cst_33 : f32 to vector<1x128xf32>
    %47 = arith.mulf %46, %35 : vector<1x128xf32>
    %48 = arith.mulf %47, %2 : vector<1x128xf32>
    %49 = vector.broadcast %38 : vector<1x128xf32> to vector<16x128xf32>
    %50 = arith.mulf %49, %0 : vector<16x128xf32>
    %51 = vector.broadcast %41 : vector<1x128xf32> to vector<16x128xf32>
    %52 = arith.mulf %51, %32 : vector<16x128xf32>
    %53 = arith.addf %50, %52 : vector<16x128xf32>
    %54 = vector.broadcast %44 : vector<1x128xf32> to vector<16x128xf32>
    %55 = arith.mulf %54, %33 : vector<16x128xf32>
    %56 = arith.addf %53, %55 : vector<16x128xf32>
    %57 = vector.broadcast %45 : vector<1x128xf32> to vector<16x128xf32>
    %58 = arith.mulf %57, %1 : vector<16x128xf32>
    %59 = arith.addf %56, %58 : vector<16x128xf32>
    %60 = arith.subf %32, %0 : vector<16x128xf32>
    %61 = vector.broadcast %36 : vector<1x128xf32> to vector<16x128xf32>
    %62 = arith.mulf %61, %60 : vector<16x128xf32>
    %63 = arith.subf %33, %32 : vector<16x128xf32>
    %64 = vector.broadcast %48 : vector<1x128xf32> to vector<16x128xf32>
    %65 = arith.mulf %64, %63 : vector<16x128xf32>
    %66 = arith.addf %62, %65 : vector<16x128xf32>
    %67 = arith.subf %1, %33 : vector<16x128xf32>
    %68 = vector.broadcast %37 : vector<1x128xf32> to vector<16x128xf32>
    %69 = arith.mulf %68, %67 : vector<16x128xf32>
    %70 = arith.addf %66, %69 : vector<16x128xf32>
    %cst_34 = arith.constant 3.000000e+00 : f32
    %71 = vector.broadcast %cst_34 : f32 to vector<16x128xf32>
    %72 = arith.mulf %71, %70 : vector<16x128xf32>
    %c0_35 = arith.constant 0 : index
    %c0_36 = arith.constant 0 : index
    %73 = vector.load %arg13[%c0_35, %c0_36] : memref<16x128xf32, #tpu.memory_space<vmem>>, vector<16x128xf32>
    tpu.vector_store %arg13[%c0_35, %c0_36], %59 {strides = array<i32>} : memref<16x128xf32, #tpu.memory_space<vmem>>, vector<16x128xf32>,
    %c0_37 = arith.constant 0 : index
    %c0_38 = arith.constant 0 : index
    %74 = vector.load %arg14[%c0_37, %c0_38] : memref<16x128xf32, #tpu.memory_space<vmem>>, vector<16x128xf32>
    tpu.vector_store %arg14[%c0_37, %c0_38], %72 {strides = array<i32>} : memref<16x128xf32, #tpu.memory_space<vmem>>, vector<16x128xf32>,
    return
  }
  func.func @transform_0(%arg0: i32) -> (i32, i32) {
    %c0_i32 = arith.constant 0 : i32
    %c0_i32_0 = arith.constant 0 : i32
    return %c0_i32, %arg0 : i32, i32
  }
  func.func @transform_1(%arg0: i32) -> (i32, i32) {
    %c0_i32 = arith.constant 0 : i32
    %c0_i32_0 = arith.constant 0 : i32
    return %c0_i32, %arg0 : i32, i32
  }
  func.func @transform_2(%arg0: i32) -> (i32, i32) {
    %c0_i32 = arith.constant 0 : i32
    %c0_i32_0 = arith.constant 0 : i32
    return %c0_i32, %arg0 : i32, i32
  }
  func.func @transform_3(%arg0: i32) -> (i32, i32) {
    %c0_i32 = arith.constant 0 : i32
    %c0_i32_0 = arith.constant 0 : i32
    %c0_i32_1 = arith.constant 0 : i32
    return %c0_i32, %c0_i32_0 : i32, i32
  }
  func.func @transform_4(%arg0: i32) -> (i32, i32) {
    %c0_i32 = arith.constant 0 : i32
    %c0_i32_0 = arith.constant 0 : i32
    %c0_i32_1 = arith.constant 0 : i32
    return %c0_i32, %c0_i32_0 : i32, i32
  }
  func.func @transform_5(%arg0: i32) -> (i32, i32) {
    %c0_i32 = arith.constant 0 : i32
    %c0_i32_0 = arith.constant 0 : i32
    %c0_i32_1 = arith.constant 0 : i32
    return %c0_i32, %c0_i32_0 : i32, i32
  }
  func.func @transform_6(%arg0: i32) -> (i32, i32) {
    %c0_i32 = arith.constant 0 : i32
    %c0_i32_0 = arith.constant 0 : i32
    %c0_i32_1 = arith.constant 0 : i32
    return %c0_i32, %c0_i32_0 : i32, i32
  }
  func.func @transform_7(%arg0: i32) -> (i32, i32) {
    %c0_i32 = arith.constant 0 : i32
    %c0_i32_0 = arith.constant 0 : i32
    %c0_i32_1 = arith.constant 0 : i32
    return %c0_i32, %c0_i32_0 : i32, i32
  }
  func.func @transform_8(%arg0: i32) -> (i32, i32) {
    %c0_i32 = arith.constant 0 : i32
    %c0_i32_0 = arith.constant 0 : i32
    %c0_i32_1 = arith.constant 0 : i32
    return %c0_i32, %c0_i32_0 : i32, i32
  }
  func.func @transform_9(%arg0: i32) -> (i32, i32) {
    %c0_i32 = arith.constant 0 : i32
    %c0_i32_0 = arith.constant 0 : i32
    %c0_i32_1 = arith.constant 0 : i32
    return %c0_i32, %c0_i32_0 : i32, i32
  }
  func.func @transform_10(%arg0: i32) -> (i32, i32) {
    %c0_i32 = arith.constant 0 : i32
    %c0_i32_0 = arith.constant 0 : i32
    %c0_i32_1 = arith.constant 0 : i32
    return %c0_i32, %c0_i32_0 : i32, i32
  }
  func.func @transform_11(%arg0: i32) -> (i32, i32) {
    %c0_i32 = arith.constant 0 : i32
    %c0_i32_0 = arith.constant 0 : i32
    %c0_i32_1 = arith.constant 0 : i32
    return %c0_i32, %c0_i32_0 : i32, i32
  }
  func.func @transform_12(%arg0: i32) -> (i32, i32) {
    %c0_i32 = arith.constant 0 : i32
    %c0_i32_0 = arith.constant 0 : i32
    return %c0_i32, %arg0 : i32, i32
  }
  func.func @transform_13(%arg0: i32) -> (i32, i32) {
    %c0_i32 = arith.constant 0 : i32
    %c0_i32_0 = arith.constant 0 : i32
    return %c0_i32, %arg0 : i32, i32
  }
}

</mosaic_0001>

<bundles_post_ra>
// kernel: bezier_interpolant3.1
= control target key start
LH: loop header
LB: loop body
LE: loop exit
PB: predicated region body
PF: predicated region fallthrough
CT: control target
= control target key end

     0   :  { %vm64_vm0 = vcmask 130048   ;;  %v1273_v2 = vmov 0   ;;  %vm443_vm1 = vcmask 523264   ;;  %s1619_s1 = inlined_call_operand.vmem [shape: f32[16,128], index: 1, kind: input, shape index: {}]   ;;  %s1620_s4 = inlined_call_operand.vmem [shape: f32[64,16], index: 4, kind: input, shape index: {}]   ;;  %s1621_s0 = inlined_call_operand.vmem [shape: f32[16,128], index: 0, kind: input, shape index: {}]   ;;  %s1622_s5 = inlined_call_operand.vmem [shape: f32[64,1], index: 5, kind: input, shape index: {}]   ;;  %s1623_s3 = inlined_call_operand.vmem [shape: f32[64,16], index: 3, kind: input, shape index: {}]   ;;  %s1624_s7 = inlined_call_operand.vmem [shape: f32[64,1], index: 7, kind: input, shape index: {}]   ;;  %s1625_s9 = inlined_call_operand.vmem [shape: f32[64,1], index: 9, kind: input, shape index: {}]   ;;  %s1626_s11 = inlined_call_operand.vmem [shape: f32[32,1], index: 11, kind: input, shape index: {}]   ;;  %s1627_s6 = inlined_call_operand.vmem [shape: f32[64,64], index: 6, kind: input, shape index: {}]   ;;  %s1628_s8 = inlined_call_operand.vmem [shape: f32[64,64], index: 8, kind: input, shape index: {}]   ;;  %s1629_s10 = inlined_call_operand.vmem [shape: f32[32,64], index: 10, kind: input, shape index: {}]   ;;  %s1630_s2 = inlined_call_operand.vmem [shape: f32[1,128], index: 2, kind: input, shape index: {}]   ;;  %s1631_s12 = inlined_call_operand.vmem [shape: f32[16,128], index: 12, kind: output, shape index: {0}]   ;;  %s1632_s13 = inlined_call_operand.vmem [shape: f32[16,128], index: 13, kind: output, shape index: {1}]  }
   0x1   :  { %v1347_v0 = vld [vmem:[%s1619_s1] sm:$0xff]  ;;  %v1352_v1 = vld [vmem:[%s1619_s1 + $0x8] sm:$0xff]  ;;  %1271 = vset.pattern.permute.xlu0 %v1273_v2  ;;  %1272 = vset.pattern.permute.xlu1 %v1273_v2  ;;  %v58_v9 = vld [vmem:[%s1620_s4 + $0x10] sm:$0xff] }
   0x2   :  { %v1206_v3 = vpack.c.bf16 %v1352_v1, %v1347_v0  ;;  %v56_v4 = vld [vmem:[%s1620_s4] sm:$0xff]  ;;  %v1368_v6 = vld [vmem:[%s1621_s0 + $0x8] sm:$0xff]  ;;  %v325_v11 = vld [vmem:[%s1622_s5 + $0x10] sm:$0xff] }
   0x3   :  { %v1362_v5 = vld [vmem:[%s1621_s0] sm:$0xff]  ;;  %1100 = vmatprep.mubr.msk.f32.mxu0 %vm64_vm0, %v56_v4  ;;  %v57_v8 = vld [vmem:[%s1620_s4 + $0x8] sm:$0xff]  ;;  %v59_v12 = vld [vmem:[%s1620_s4 + $0x18] sm:$0xff]  ;;  %343 = vperm.xlu1 %1272, %v325_v11  }
   0x4   :  { %1207 = vmatprep.subr.bf16.mxu0 %v1206_v3  ;;  %v1210_v7 = vpack.c.bf16 %v1368_v6, %v1362_v5  ;;  %v323_v10 = vld [vmem:[%s1622_s5] sm:$0xff]  ;;  %v324_v14 = vld [vmem:[%s1622_s5 + $0x8] sm:$0xff]  ;;  %v326_v15 = vld [vmem:[%s1622_s5 + $0x18] sm:$0xff] }
   0x5   :  { %1209 = vmatpush3.bf16.msra.mxu0 %v1206_v3  ;;  %v60_v13 = vld [vmem:[%s1620_s4 + $0x20] sm:$0xff]  ;;  %333 = vperm.xlu0 %1271, %v323_v10   ;;  %v61_v16 = vld [vmem:[%s1620_s4 + $0x28] sm:$0xff]  ;;  %v62_v17 = vld [vmem:[%s1620_s4 + $0x30] sm:$0xff] }
   0x6   :  { %1211 = vmatprep.subr.bf16.mxu0 %v1210_v7  ;;  %v327_v18 = vld [vmem:[%s1622_s5 + $0x20] sm:$0xff]  ;;  %v328_v19 = vld [vmem:[%s1622_s5 + $0x28] sm:$0xff]  ;;  %v63_v20 = vld [vmem:[%s1620_s4 + $0x38] sm:$0xff] }
   0x7   :  { %348 = vperm.xlu1 %1272, %v326_v15   ;;  %v48_v21 = vld [vmem:[%s1623_s3] sm:$0xff]  ;;  %v329_v22 = vld [vmem:[%s1622_s5 + $0x30] sm:$0xff]  ;;  %v330_v23 = vld [vmem:[%s1622_s5 + $0x38] sm:$0xff] }
   0x8   :  { %1101 = vmatmul.mubr.msk.f32.vlgmr.msra.gmra.mrb[0].mxu0 %vm64_vm0, %v57_v8  ;;  %v49_v24 = vld [vmem:[%s1623_s3 + $0x8] sm:$0xff]  ;;  %v50_v25 = vld [vmem:[%s1623_s3 + $0x10] sm:$0xff]  ;;  %v395_v26 = vld [vmem:[%s1624_s7] sm:$0xff] }
   0x9   :  { %1213 = vmatpush3.bf16.msra.mxu0 %v1210_v7  ;;  %1103 = vmatprep.mubr.msk.f32.mxu0 %vm64_vm0, %v58_v9  ;;  %v396_v27 = vld [vmem:[%s1624_s7 + $0x8] sm:$0xff]  ;;  %v51_v28 = vld [vmem:[%s1623_s3 + $0x18] sm:$0xff]  ;;  %v52_v29 = vld [vmem:[%s1623_s3 + $0x20] sm:$0xff] }
   0xa   :  { %338 = vperm.xlu0 %1271, %v324_v14   ;;  %v397_v30 = vld [vmem:[%s1624_s7 + $0x10] sm:$0xff]  ;;  %v398_v31 = vld [vmem:[%s1624_s7 + $0x18] sm:$0xff]  ;;  %v53_v32 = vld [vmem:[%s1623_s3 + $0x28] sm:$0xff] }
   0xb   :  { %358 = vperm.xlu1 %1272, %v328_v19   ;;  %v54_v33 = vld [vmem:[%s1623_s3 + $0x30] sm:$0xff]  ;;  %v399_v34 = vld [vmem:[%s1624_s7 + $0x20] sm:$0xff]  ;;  %v400_v35 = vld [vmem:[%s1624_s7 + $0x28] sm:$0xff] }
   0xc   :  { %1104 = vmatmul.mubr.msk.f32.gmra.mrb[2].mxu0 %vm64_vm0, %v59_v12  ;;  %v55_v36 = vld [vmem:[%s1623_s3 + $0x38] sm:$0xff]  ;;  %v401_v37 = vld [vmem:[%s1624_s7 + $0x30] sm:$0xff]  ;;  %v589_v39 = vld [vmem:[%s1625_s9] sm:$0xff] }
   0xd   :  { %1106 = vmatprep.mubr.msk.f32.mxu0 %vm64_vm0, %v60_v13  ;;  %v402_v38 = vld [vmem:[%s1624_s7 + $0x38] sm:$0xff]  ;;  %v590_v40 = vld [vmem:[%s1625_s9 + $0x8] sm:$0xff]  ;;  %v591_v41 = vld [vmem:[%s1625_s9 + $0x10] sm:$0xff] }
   0xe   :  { %353 = vperm.xlu0 %1271, %v327_v18   ;;  %v592_v42 = vld [vmem:[%s1625_s9 + $0x18] sm:$0xff]  ;;  %v593_v43 = vld [vmem:[%s1625_s9 + $0x20] sm:$0xff]  ;;  %v594_v44 = vld [vmem:[%s1625_s9 + $0x28] sm:$0xff] }
   0xf   :  { %368 = vperm.xlu1 %1272, %v330_v23   ;;  %v595_v45 = vld [vmem:[%s1625_s9 + $0x30] sm:$0xff]  ;;  %v596_v46 = vld [vmem:[%s1625_s9 + $0x38] sm:$0xff]  ;;  %v778_v47 = vld [vmem:[%s1626_s11] sm:$0xff] }
  0x10   :  { %1107 = vmatmul.mubr.msk.f32.gmra.mrb[4].mxu0 %vm64_vm0, %v61_v16  ;;  %v779_v48 = vld [vmem:[%s1626_s11 + $0x8] sm:$0xff]  ;;  %v780_v49 = vld [vmem:[%s1626_s11 + $0x10] sm:$0xff]  ;;  %v781_v50 = vld [vmem:[%s1626_s11 + $0x18] sm:$0xff] }
  0x11   :  { %1109 = vmatprep.mubr.msk.f32.mxu0 %vm64_vm0, %v62_v17  ;;  %v387_v51 = vld [vmem:[%s1627_s6] sm:$0xff] }
  0x12   :  { %363 = vperm.xlu0 %1271, %v329_v22   ;;  %1144 = vmatprep.mubr.msk.f32.mxu1 %vm443_vm1, %v387_v51 }
  0x13   :  { %410 = vperm.xlu1 %1272, %v396_v27  }
  0x14   :  { %1110 = vmatmul.mubr.msk.f32.gmra.mrb[6].mxu0 %vm64_vm0, %v63_v20 }
  0x15   :  { %1116 = vmatprep.mubr.msk.f32.mxu0 %vm64_vm0, %v48_v21 }
  0x16   :  { %405 = vperm.xlu0 %1271, %v395_v26  }
  0x17   :  { %420 = vperm.xlu1 %1272, %v398_v31   ;;  %v391_v31 = vld [vmem:[%s1627_s6 + $0x20] sm:$0xff] }
  0x18   :  { %1117 = vmatmul.mubr.msk.f32.vlgmr.msra.gmra.mrb[0].mxu0 %vm64_vm0, %v49_v24 }
  0x19   :  { %1119 = vmatprep.mubr.msk.f32.mxu0 %vm64_vm0, %v50_v25 }
  0x1a   :  { %415 = vperm.xlu0 %1271, %v397_v30   ;;  %v390_v30 = vld [vmem:[%s1627_s6 + $0x18] sm:$0xff] }
  0x1b   :  { %430 = vperm.xlu1 %1272, %v400_v35   ;;  %v581_v35 = vld [vmem:[%s1628_s8] sm:$0xff] }
  0x1c   :  { %1120 = vmatmul.mubr.msk.f32.gmra.mrb[2].mxu0 %vm64_vm0, %v51_v28  ;;  %v388_v28 = vld [vmem:[%s1627_s6 + $0x8] sm:$0xff] }
  0x1d   :  { %1122 = vmatprep.mubr.msk.f32.mxu0 %vm64_vm0, %v52_v29  ;;  %v389_v29 = vld [vmem:[%s1627_s6 + $0x10] sm:$0xff] }
  0x1e   :  { %425 = vperm.xlu0 %1271, %v399_v34   ;;  %v394_v34 = vld [vmem:[%s1627_s6 + $0x38] sm:$0xff] }
  0x1f   :  { %440 = vperm.xlu1 %1272, %v402_v38  }
  0x20   :  { %1123 = vmatmul.mubr.msk.f32.gmra.mrb[4].mxu0 %vm64_vm0, %v53_v32  ;;  %v392_v32 = vld [vmem:[%s1627_s6 + $0x28] sm:$0xff] }
  0x21   :  { %1125 = vmatprep.mubr.msk.f32.mxu0 %vm64_vm0, %v54_v33  ;;  %v393_v33 = vld [vmem:[%s1627_s6 + $0x30] sm:$0xff] }
  0x22   :  { %435 = vperm.xlu0 %1271, %v401_v37  }
  0x23   :  { %604 = vperm.xlu1 %1272, %v590_v40  }
  0x24   :  { %1126 = vmatmul.mubr.msk.f32.gmra.mrb[6].mxu0 %vm64_vm0, %v55_v36 }
  0x26   :  { %599 = vperm.xlu0 %1271, %v589_v39  }
  0x27   :  { %614 = vperm.xlu1 %1272, %v592_v42  }
  0x2a   :  { %609 = vperm.xlu0 %1271, %v591_v41  }
  0x2b   :  { %624 = vperm.xlu1 %1272, %v594_v44  }
  0x2e   :  { %619 = vperm.xlu0 %1271, %v593_v43  }
  0x2f   :  { %634 = vperm.xlu1 %1272, %v596_v46  }
  0x32   :  { %629 = vperm.xlu0 %1271, %v595_v45  }
  0x33   :  { %789 = vperm.xlu1 %1272, %v779_v48  }
  0x36   :  { %784 = vperm.xlu0 %1271, %v778_v47  }
  0x37   :  { %799 = vperm.xlu1 %1272, %v781_v50  }
  0x3a   :  { %794 = vperm.xlu0 %1271, %v780_v49  }
  0x82   :  { %v344_v53 = vpop.permute.xlu1 %343 }
  0x84   :  { %v334_v52 = vpop.permute.xlu0 %333 }
  0x86   :  { %v349_v55 = vpop.permute.xlu1 %348 }
  0x89   :  { %v339_v54 = vpop.permute.xlu0 %338 }
  0x8a   :  { %v359_v3 = vpop.permute.xlu1 %358 }
  0x8d   :  { %v354_v8 = vpop.permute.xlu0 %353 }
  0x8e   :  { %v369_v17 = vpop.permute.xlu1 %368 }
  0x91   :  { %v364_v20 = vpop.permute.xlu0 %363 }
  0x92   :  { %v411_v36 = vpop.permute.xlu1 %410 }
  0x95   :  { %v406_v37 = vpop.permute.xlu0 %405 }
  0x96   :  { %v421_v38 = vpop.permute.xlu1 %420 }
  0x99   :  { %v416_v40 = vpop.permute.xlu0 %415 }
  0x9a   :  { %v431_v49 = vpop.permute.xlu1 %430 }
  0xeb   :  { %v1118_v56 = vpop.f32.mrb[0].mxu0 }
  0xec   :  { %v372_v57 = vadd.f32 %v1118_v56, %v339_v54  ;;  %v284_v58 = vpop.f32.mrb[1].mxu0 }
  0xed   :  { %v371_v59 = vadd.f32 %v334_v52, %v284_v58  ;;  %v426_v52 = vpop.permute.xlu0 %425 }
  0xee   :  { %v380_v60 = vmax.f32 %v372_v57, 0.0 }
  0xef   :  { %v379_v61 = vmax.f32 %v371_v59, 0.0  ;;  %v1121_v62 = vpop.f32.mrb[2].mxu0 }
  0xf0   :  { %v374_v63 = vadd.f32 %v1121_v62, %v349_v55  ;;  %v294_v2 = vpop.f32.mrb[3].mxu0 }
  0xf1   :  { %v373_v4 = vadd.f32 %v344_v53, %v294_v2  ;;  %v1214_v7 = vpack.c.bf16 %v380_v60, %v379_v61  ;;  %v441_v61 = vpop.permute.xlu1 %440  ;;  %v436_v2 = vpop.permute.xlu0 %435 }
  0xf2   :  { %v382_v9 = vmax.f32 %v374_v63, 0.0 }
  0xf3   :  { %v381_v10 = vmax.f32 %v373_v4, 0.0  ;;  %v1124_v11 = vpop.f32.mrb[4].mxu0  ;;  %1215 = vmatprep.subr.bf16.mxu1 %v1214_v7 }
  0xf4   :  { %v376_v12 = vadd.f32 %v1124_v11, %v359_v3  ;;  %v304_v13 = vpop.f32.mrb[5].mxu0  ;;  %1217 = vmatpush3.bf16.msra.mxu1 %v1214_v7 }
  0xf5   :  { %v1218_v14 = vpack.c.bf16 %v382_v9, %v381_v10  ;;  %v375_v15 = vadd.f32 %v354_v8, %v304_v13  ;;  %v583_v13 = vld [vmem:[%s1628_s8 + $0x10] sm:$0xff] }
  0xf6   :  { %v384_v16 = vmax.f32 %v376_v12, 0.0  ;;  %v582_v12 = vld [vmem:[%s1628_s8 + $0x8] sm:$0xff] }
  0xf7   :  { %v383_v18 = vmax.f32 %v375_v15, 0.0  ;;  %v1127_v19 = vpop.f32.mrb[6].mxu0  ;;  %1219 = vmatprep.subr.bf16.mxu1 %v1218_v14  ;;  %v585_v15 = vld [vmem:[%s1628_s8 + $0x20] sm:$0xff] }
  0xf8   :  { %v378_v21 = vadd.f32 %v1127_v19, %v369_v17  ;;  %v314_v22 = vpop.f32.mrb[7].mxu0  ;;  %1221 = vmatpush3.bf16.msra.mxu1 %v1218_v14  ;;  %v584_v14 = vld [vmem:[%s1628_s8 + $0x18] sm:$0xff]  ;;  %v587_v17 = vld [vmem:[%s1628_s8 + $0x30] sm:$0xff]  ;;  %v774_v19 = vld [vmem:[%s1629_s10] sm:$0xff] }
  0xf9   :  { %v1222_v23 = vpack.c.bf16 %v384_v16, %v383_v18  ;;  %v377_v24 = vadd.f32 %v364_v20, %v314_v22  ;;  %v586_v16 = vld [vmem:[%s1628_s8 + $0x28] sm:$0xff]  ;;  %v588_v18 = vld [vmem:[%s1628_s8 + $0x38] sm:$0xff]  ;;  %1200 = vmatprep.mubr.msk.f32.mxu0 %vm443_vm1, %v774_v19  ;;  %v605_v20 = vpop.permute.xlu1 %604 }
  0xfa   :  { %v386_v25 = vmax.f32 %v378_v21, 0.0  ;;  %v600_v21 = vpop.permute.xlu0 %599 }
  0xfb   :  { %v385_v26 = vmax.f32 %v377_v24, 0.0  ;;  %1223 = vmatprep.subr.bf16.mxu1 %v1222_v23 }
  0xfc   :  { %1225 = vmatpush3.bf16.msra.mxu1 %v1222_v23 }
  0xfd   :  { %v1226_v27 = vpack.c.bf16 %v386_v25, %v385_v26  ;;  %v615_v22 = vpop.permute.xlu1 %614 }
  0xfe   :  { %v610_v24 = vpop.permute.xlu0 %609 }
  0xff   :  { %1227 = vmatprep.subr.bf16.mxu1 %v1226_v27 }
 0x100   :  { %1229 = vmatpush3.bf16.msra.mxu1 %v1226_v27 }
 0x103   :  { %1145 = vmatmul.mubr.msk.f32.vlgmr.msra.gmra.mrb[0].mxu1 %vm443_vm1, %v388_v28 }
 0x104   :  { %1147 = vmatprep.mubr.msk.f32.mxu1 %vm443_vm1, %v389_v29 }
 0x107   :  { %1148 = vmatmul.mubr.msk.f32.gmra.mrb[2].mxu1 %vm443_vm1, %v390_v30 }
 0x108   :  { %1150 = vmatprep.mubr.msk.f32.mxu1 %vm443_vm1, %v391_v31 }
 0x10b   :  { %1151 = vmatmul.mubr.msk.f32.gmra.mrb[4].mxu1 %vm443_vm1, %v392_v32 }
 0x10c   :  { %1153 = vmatprep.mubr.msk.f32.mxu1 %vm443_vm1, %v393_v33  ;;  %v625_v33 = vpop.permute.xlu1 %624 }
 0x10f   :  { %1154 = vmatmul.mubr.msk.f32.gmra.mrb[6].mxu1 %vm443_vm1, %v394_v34 }
 0x110   :  { %1172 = vmatprep.mubr.msk.f32.mxu1 %vm443_vm1, %v581_v35 }
 0x1d6   :  { %v1146_v39 = vpop.f32.mrb[0].mxu1 }
 0x1d7   :  { %v540_v41 = vadd.f32 %v1146_v39, %v411_v36  ;;  %v534_v42 = vpop.f32.mrb[1].mxu1  ;;  %v620_v36 = vpop.permute.xlu0 %619 }
 0x1d8   :  { %v535_v43 = vadd.f32 %v534_v42, %v406_v37 }
 0x1d9   :  { %v574_v44 = vmax.f32 %v540_v41, 0.0 }
 0x1da   :  { %v573_v45 = vmax.f32 %v535_v43, 0.0  ;;  %v1149_v46 = vpop.f32.mrb[2].mxu1 }
 0x1db   :  { %v550_v47 = vadd.f32 %v1149_v46, %v421_v38  ;;  %v544_v48 = vpop.f32.mrb[3].mxu1 }
 0x1dc   :  { %v1230_v50 = vpack.c.bf16 %v574_v44, %v573_v45  ;;  %v545_v51 = vadd.f32 %v544_v48, %v416_v40  ;;  %v635_v45 = vpop.permute.xlu1 %634  ;;  %v630_v48 = vpop.permute.xlu0 %629 }
 0x1dd   :  { %v576_v53 = vmax.f32 %v550_v47, 0.0 }
 0x1de   :  { %v575_v54 = vmax.f32 %v545_v51, 0.0  ;;  %v1152_v55 = vpop.f32.mrb[4].mxu1  ;;  %1231 = vmatprep.subr.bf16.mxu1 %v1230_v50 }
 0x1df   :  { %v560_v56 = vadd.f32 %v1152_v55, %v431_v49  ;;  %v554_v57 = vpop.f32.mrb[5].mxu1  ;;  %1233 = vmatpush3.bf16.msra.mxu1 %v1230_v50 }
 0x1e0   :  { %v1234_v58 = vpack.c.bf16 %v576_v53, %v575_v54  ;;  %v555_v59 = vadd.f32 %v554_v57, %v426_v52  ;;  %v776_v57 = vld [vmem:[%s1629_s10 + $0x10] sm:$0xff] }
 0x1e1   :  { %v578_v60 = vmax.f32 %v560_v56, 0.0  ;;  %v775_v56 = vld [vmem:[%s1629_s10 + $0x8] sm:$0xff] }
 0x1e2   :  { %v577_v62 = vmax.f32 %v555_v59, 0.0  ;;  %v1155_v63 = vpop.f32.mrb[6].mxu1  ;;  %1235 = vmatprep.subr.bf16.mxu1 %v1234_v58  ;;  %v47_v59 = vld [vmem:[%s1630_s2] sm:$0x1] }
 0x1e3   :  { %v570_v3 = vadd.f32 %v1155_v63, %v441_v61  ;;  %v564_v4 = vpop.f32.mrb[7].mxu1  ;;  %1237 = vmatpush3.bf16.msra.mxu1 %v1234_v58  ;;  %v777_v58 = vld [vmem:[%s1629_s10 + $0x18] sm:$0xff]  ;;  %v911_v61 = vlaneseq }
 0x1e4   :  { %v1238_v7 = vpack.c.bf16 %v578_v60, %v577_v62  ;;  %v565_v8 = vadd.f32 %v564_v4, %v436_v2  ;;  %v899_v60 = vsub.f32 1.0, %v47_v59 }
 0x1e5   :  { %v580_v9 = vmax.f32 %v570_v3, 0.0  ;;  %v912_v63 = vshrl.u32 %v911_v61, 7  ;;  %v901_v3 = vmul.f32 %v47_v59, %v47_v59 }
 0x1e6   :  { %v579_v10 = vmax.f32 %v565_v8, 0.0  ;;  %1239 = vmatprep.subr.bf16.mxu1 %v1238_v7  ;;  %v900_v62 = vmul.f32 %v899_v60, %v899_v60 }
 0x1e7   :  { %1241 = vmatpush3.bf16.msra.mxu1 %v1238_v7  ;;  %v913_v4 = vsub.s32 0, %v912_v63 }
 0x1e8   :  { %v1242_v11 = vpack.c.bf16 %v580_v9, %v579_v10  ;;  %v903_v2 = vmul.f32 3.0, %v900_v62  ;;  %v902_v7 = vmul.f32 %v900_v62, %v899_v60  ;;  %v905_v9 = vmul.f32 3.0, %v899_v60 }
 0x1e9   :  { %v907_v10 = vmul.f32 %v901_v3, %v47_v59 }
 0x1ea   :  { %1243 = vmatprep.subr.bf16.mxu1 %v1242_v11  ;;  %v904_v8 = vmul.f32 %v903_v2, %v47_v59 }
 0x1eb   :  { %1245 = vmatpush3.bf16.msra.mxu1 %v1242_v11  ;;  %v908_v11 = vmul.f32 2.0, %v899_v60 }
 0x1ee   :  { %1173 = vmatmul.mubr.msk.f32.vlgmr.msra.gmra.mrb[8].mxu1 %vm443_vm1, %v582_v12  ;;  %v790_v12 = vpop.permute.xlu1 %789 }
 0x1ef   :  { %1175 = vmatprep.mubr.msk.f32.mxu1 %vm443_vm1, %v583_v13  ;;  %v914_v13 = vrot.slane %v902_v7, %v913_v4 }
 0x1f2   :  { %1176 = vmatmul.mubr.msk.f32.gmra.mrb[10].mxu1 %vm443_vm1, %v584_v14  ;;  %v785_v14 = vpop.permute.xlu0 %784 }
 0x1f3   :  { %1178 = vmatprep.mubr.msk.f32.mxu1 %vm443_vm1, %v585_v15  ;;  %v922_v15 = vrot.slane %v904_v8, %v913_v4 }
 0x1f6   :  { %1179 = vmatmul.mubr.msk.f32.gmra.mrb[12].mxu1 %vm443_vm1, %v586_v16  ;;  %v906_v16 = vmul.f32 %v905_v9, %v901_v3 }
 0x1f7   :  { %1181 = vmatprep.mubr.msk.f32.mxu1 %vm443_vm1, %v587_v17  ;;  %v942_v17 = vrot.slane %v907_v10, %v913_v4 }
 0x1fa   :  { %1182 = vmatmul.mubr.msk.f32.gmra.mrb[14].mxu1 %vm443_vm1, %v588_v18 }
 0x2c1   :  { %v1174_v23 = vpop.f32.mrb[8].mxu1 }
 0x2c2   :  { %v733_v25 = vadd.f32 %v1174_v23, %v605_v20  ;;  %v727_v26 = vpop.f32.mrb[9].mxu1  ;;  %v917_v23 = vmul.f32 %v914_v13, %v1368_v6 }
 0x2c3   :  { %v728_v27 = vadd.f32 %v727_v26, %v600_v21  ;;  %v909_v21 = vmul.f32 %v908_v11, %v47_v59  ;;  %v944_v26 = vmul.f32 %v942_v17, %v1347_v0 }
 0x2c4   :  { %v767_v28 = vmax.f32 %v733_v25, 0.0  ;;  %v932_v25 = vrot.slane %v906_v16, %v913_v4 }
 0x2c5   :  { %v766_v29 = vmax.f32 %v728_v27, 0.0  ;;  %v1177_v30 = vpop.f32.mrb[10].mxu1  ;;  %v916_v27 = vmul.f32 %v914_v13, %v1362_v5 }
 0x2c6   :  { %v743_v31 = vadd.f32 %v1177_v30, %v615_v22  ;;  %v737_v32 = vpop.f32.mrb[11].mxu1 }
 0x2c7   :  { %v1246_v34 = vpack.c.bf16 %v767_v28, %v766_v29  ;;  %v738_v35 = vadd.f32 %v737_v32, %v610_v24  ;;  %v800_v28 = vpop.permute.xlu1 %799 }
 0x2c8   :  { %v769_v37 = vmax.f32 %v743_v31, 0.0  ;;  %v795_v31 = vpop.permute.xlu0 %794 }
 0x2c9   :  { %v768_v38 = vmax.f32 %v738_v35, 0.0  ;;  %v1180_v39 = vpop.f32.mrb[12].mxu1  ;;  %1247 = vmatprep.subr.bf16.mxu0 %v1246_v34  ;;  %v964_v35 = vrot.slane %v909_v21, %v913_v4 }
 0x2ca   :  { %v753_v40 = vadd.f32 %v1180_v39, %v625_v33  ;;  %v747_v41 = vpop.f32.mrb[13].mxu1  ;;  %1249 = vmatpush3.bf16.msra.mxu0 %v1246_v34  ;;  %v954_v33 = vrot.slane %v900_v62, %v913_v4  ;;  %v976_v39 = vrot.slane %v901_v3, %v913_v4 }
 0x2cb   :  { %v1250_v42 = vpack.c.bf16 %v769_v37, %v768_v38  ;;  %v748_v43 = vadd.f32 %v747_v41, %v620_v36  ;;  %v945_v37 = vmul.f32 %v942_v17, %v1352_v1 }
 0x2cc   :  { %v771_v44 = vmax.f32 %v753_v40, 0.0 }
 0x2cd   :  { %v770_v46 = vmax.f32 %v748_v43, 0.0  ;;  %v1183_v47 = vpop.f32.mrb[14].mxu1  ;;  %1251 = vmatprep.subr.bf16.mxu0 %v1250_v42 }
 0x2ce   :  { %v763_v49 = vadd.f32 %v1183_v47, %v635_v45  ;;  %v757_v50 = vpop.f32.mrb[15].mxu1  ;;  %1253 = vmatpush3.bf16.msra.mxu0 %v1250_v42 }
 0x2cf   :  { %v1254_v51 = vpack.c.bf16 %v771_v44, %v770_v46  ;;  %v758_v52 = vadd.f32 %v757_v50, %v630_v48 }
 0x2d0   :  { %v773_v53 = vmax.f32 %v763_v49, 0.0 }
 0x2d1   :  { %v772_v54 = vmax.f32 %v758_v52, 0.0  ;;  %1255 = vmatprep.subr.bf16.mxu0 %v1254_v51 }
 0x2d2   :  { %1257 = vmatpush3.bf16.msra.mxu0 %v1254_v51 }
 0x2d3   :  { %v1258_v55 = vpack.c.bf16 %v773_v53, %v772_v54 }
 0x2d5   :  { %1259 = vmatprep.subr.bf16.mxu0 %v1258_v55 }
 0x2d6   :  { %1261 = vmatpush3.bf16.msra.mxu0 %v1258_v55 }
 0x2d9   :  { %1201 = vmatmul.mubr.msk.f32.vlgmr.msra.gmra.mrb[8].mxu0 %vm443_vm1, %v775_v56 }
 0x2da   :  { %1203 = vmatprep.mubr.msk.f32.mxu0 %vm443_vm1, %v776_v57 }
 0x2dd   :  { %1204 = vmatmul.mubr.msk.f32.gmra.mrb[10].mxu0 %vm443_vm1, %v777_v58 }
 0x3ac   :  { %v1202_v18 = vpop.f32.mrb[8].mxu0 }
 0x3ad   :  { %v886_v19 = vadd.f32 %v1202_v18, %v790_v12  ;;  %v880_v20 = vpop.f32.mrb[9].mxu0 }
 0x3ae   :  { %v881_v22 = vadd.f32 %v880_v20, %v785_v14 }
 0x3af   :  { %v925_v24 = vmul.f32 %v922_v15, %v886_v19  ;;  %v949_v32 = vsub.f32 %v886_v19, %v1368_v6 }
 0x3b0   :  { %v924_v29 = vmul.f32 %v922_v15, %v881_v22  ;;  %v1205_v30 = vpop.f32.mrb[10].mxu0  ;;  %v948_v38 = vsub.f32 %v881_v22, %v1362_v5 }
 0x3b1   :  { %v896_v34 = vadd.f32 %v1205_v30, %v800_v28  ;;  %v890_v36 = vpop.f32.mrb[11].mxu0  ;;  %v927_v41 = vadd.f32 %v925_v24, %v917_v23  ;;  %v957_v48 = vmul.f32 %v954_v33, %v949_v32 }
 0x3b2   :  { %v891_v40 = vadd.f32 %v890_v36, %v795_v31  ;;  %v926_v45 = vadd.f32 %v924_v29, %v916_v27  ;;  %v956_v51 = vmul.f32 %v954_v33, %v948_v38 }
 0x3b3   :  { %v935_v42 = vmul.f32 %v932_v25, %v896_v34  ;;  %v959_v43 = vsub.f32 %v896_v34, %v886_v19  ;;  %v971_v44 = vsub.f32 %v1352_v1, %v896_v34 }
 0x3b4   :  { %v934_v46 = vmul.f32 %v932_v25, %v891_v40  ;;  %v958_v47 = vsub.f32 %v891_v40, %v881_v22  ;;  %v970_v6 = vsub.f32 %v1347_v0, %v891_v40 }
 0x3b5   :  { %v937_v49 = vadd.f32 %v935_v42, %v927_v41  ;;  %v967_v50 = vmul.f32 %v964_v35, %v959_v43  ;;  %v979_v55 = vmul.f32 %v976_v39, %v971_v44 }
 0x3b6   :  { %v936_v52 = vadd.f32 %v934_v46, %v926_v45  ;;  %v966_v53 = vmul.f32 %v964_v35, %v958_v47  ;;  %v978_v58 = vmul.f32 %v976_v39, %v970_v6 }
 0x3b7   :  { %v947_v54 = vadd.f32 %v945_v37, %v937_v49  ;;  %v969_v5 = vadd.f32 %v967_v50, %v957_v48 }
 0x3b8   :  { %v946_v56 = vadd.f32 %v944_v26, %v936_v52  ;;  %v968_v57 = vadd.f32 %v966_v53, %v956_v51 }
 0x3b9   :  { %v981_v59 = vadd.f32 %v979_v55, %v969_v5  ;;  %985 = vst [vmem:[%s1631_s12 + $0x8] sm:$0xff] %v947_v54 }
 0x3ba   :  { %v980_v1 = vadd.f32 %v978_v58, %v968_v57  ;;  %984 = vst [vmem:[%s1631_s12] sm:$0xff] %v946_v56 }
 0x3bb   :  { %v983_v0 = vmul.f32 3.0, %v981_v59 }
 0x3bc   :  { %v982_v60 = vmul.f32 3.0, %v980_v1 }
 0x3bd   :  { %987 = vst [vmem:[%s1632_s13 + $0x8] sm:$0xff] %v983_v0 }
 0x3be   :  { %986 = vst [vmem:[%s1632_s13] sm:$0xff] %v982_v60 }

</bundles_post_ra>
